<compile_context>
chip_gen: v5e
topology: v5e:2x2
jax: 0.10.0
libtpu: 0.0.40
codegen_flags: <defaults>
</compile_context>

<pallas_src>
import functools

import numpy as np
import jax
import jax.numpy as jnp
from jax.experimental import pallas as pl
from jax.experimental.pallas import tpu as pltpu


def make_gaussian_kernel_1d(kernel_size: int, std: float) -> np.ndarray:
    """Normalized 1-D Gaussian taps; the 2-D blur kernel is outer(g, g).

    Separable stand-in for scipy.ndimage.gaussian_filter applied to a KxK
    impulse (close but not bit-identical; the module only needs a Gaussian).
    """
    c = kernel_size // 2
    x = np.arange(kernel_size, dtype=np.float64) - c
    g = np.exp(-0.5 * (x / std) ** 2)
    g = g / g.sum()
    return g.astype(np.float32)


def _reflect_pad_cols(x, pad, W):
    # Columns on lanes. ReflectionPad semantics (no edge repeat):
    #   padded col j (j < pad)        <- source col (pad - j)
    #   padded col (pad + W + r)      <- source col (W - 2 - r)
    left = [x[:, pad - j:pad - j + 1] for j in range(pad)]
    right = [x[:, W - 2 - r:W - 1 - r] for r in range(pad)]
    return jnp.concatenate(left + [x] + right, axis=1)          # (H, W + 2*pad)


def _reflect_pad_rows(x, pad, H):
    # Rows on sublanes, same reflection rule along axis 0.
    top = [x[pad - j:pad - j + 1, :] for j in range(pad)]
    bot = [x[H - 2 - r:H - 1 - r, :] for r in range(pad)]
    return jnp.concatenate(top + [x] + bot, axis=0)              # (H + 2*pad, W)


def _blur_kernel(x_ref, o_ref, *, H, W, pad, taps):
    # x_ref / o_ref: (1, 1, H, W) blocks -- one channel image of one batch
    # element per grid step.  Rows -> sublanes, columns -> lanes.
    K = len(taps)
    x = x_ref[...][0, 0].astype(jnp.float32)                     # (H, W)

    # --- horizontal pass: reflect-pad along lanes, then 1-D conv in W ---
    xpad = _reflect_pad_cols(x, pad, W) if pad else x            # (H, W + 2*pad)
    th = xpad[:, 0:W] * taps[0]
    for k in range(1, K):
        th = th + xpad[:, k:k + W] * taps[k]                     # (H, W)

    # --- vertical pass: reflect-pad along sublanes, then 1-D conv in H ---
    # (row-wise conv commutes with duplicating/reflecting whole rows, so
    #  pad_w -> conv_w -> pad_h -> conv_h == pad_both -> conv2d exactly)
    thp = _reflect_pad_rows(th, pad, H) if pad else th            # (H + 2*pad, W)
    out = thp[0:H, :] * taps[0]
    for k in range(1, K):
        out = out + thp[k:k + H, :] * taps[k]                     # (H, W)

    o_ref[...] = out[None, None].astype(o_ref.dtype)


def blurkernel_forward(x: jax.Array, kernel1d) -> jax.Array:
    """Forward pass of Blurkernel: reflection pad + depthwise (groups=C) conv
    with the separable Gaussian kernel outer(kernel1d, kernel1d)."""
    N, C, H, W = x.shape
    g = np.asarray(kernel1d, dtype=np.float32)
    K = int(g.shape[0])
    assert K % 2 == 1, "kernel_size must be odd (pad = K//2, same-size output)"
    pad = K // 2
    assert pad < H and pad < W, "ReflectionPad2d requires pad < spatial size"

    taps = tuple(float(v) for v in g)            # compile-time constants

    kernel_fn = functools.partial(_blur_kernel, H=H, W=W, pad=pad, taps=taps)

    # Grid over (batch, channel): each step is an independent channel image,
    # both axes "parallel".  Block shapes keep the full (H, W) extents, so the
    # (8, 128) BlockSpec constraint is satisfied for any H, W.
    return pl.pallas_call(
        kernel_fn,
        out_shape=jax.ShapeDtypeStruct((N, C, H, W), x.dtype),
        grid_spec=pltpu.PrefetchScalarGridSpec(
            num_scalar_prefetch=0,
            grid=(N, C),
            in_specs=[pl.BlockSpec((1, 1, H, W), lambda n, c: (n, c, 0, 0))],
            out_specs=pl.BlockSpec((1, 1, H, W), lambda n, c: (n, c, 0, 0)),
        ),
        compiler_params=pltpu.CompilerParams(
            dimension_semantics=("parallel", "parallel")
        ),
    )(x)


def reference_forward_np(x, kernel1d) -> np.ndarray:
    """float64 numpy reference: reflect pad + depthwise conv with outer(g, g)."""
    xn = np.asarray(x, dtype=np.float64)
    g = np.asarray(kernel1d, dtype=np.float64)
    K = g.shape[0]
    pad = K // 2
    k2 = np.outer(g, g)
    N, C, H, W = xn.shape
    xp = np.pad(xn, ((0, 0), (0, 0), (pad, pad), (pad, pad)), mode="reflect")
    out = np.zeros_like(xn)
    for i in range(K):
        for j in range(K):
            out += k2[i, j] * xp[:, :, i:i + H, j:j + W]
    return out


if __name__ == "__main__":
    # Small shapes consistent with the module: Conv2d(3, 3, K, groups=3) -> C = 3.
    N, C, H, W = 2, 3, 16, 16
    kernel_size, std = 7, 1.5

    key = jax.random.PRNGKey(0)
    x = jax.random.normal(key, (N, C, H, W), dtype=jnp.float32)
    g1 = make_gaussian_kernel_1d(kernel_size, std)

    out = jax.block_until_ready(blurkernel_forward(x, g1))

    ref = reference_forward_np(x, g1)
    np.testing.assert_allclose(np.asarray(out), ref, rtol=1e-5, atol=1e-5)

    assert out.shape == (N, C, H, W) and out.dtype == x.dtype
    print("KERNEL_OK")
</pallas_src>

<mosaic_0001>
module attributes {stable_mosaic.version = 11 : i64} {
  func.func @_blur_kernel(%arg0: i32, %arg1: i32, %arg2: memref<1x1x16x16xf32, #tpu.memory_space<vmem>>, %arg3: memref<1x1x16x16xf32, #tpu.memory_space<vmem>>) attributes {dimension_semantics = [#tpu.dimension_semantics<parallel>, #tpu.dimension_semantics<parallel>], iteration_bounds = array<i64: 2, 3>, scalar_prefetch = 0 : i64, scratch_operands = 0 : i64, tpu.core_type = #tpu.core_type<tc>, window_params = [{transform_indices = @transform_0, window_bounds = array<i64: 1, 1, 16, 16>}, {transform_indices = @transform_1, window_bounds = array<i64: 1, 1, 16, 16>}]} {
    %c0 = arith.constant 0 : index
    %c0_0 = arith.constant 0 : index
    %c0_1 = arith.constant 0 : index
    %c0_2 = arith.constant 0 : index
    %0 = vector.load %arg2[%c0, %c0_0, %c0_1, %c0_2] : memref<1x1x16x16xf32, #tpu.memory_space<vmem>>, vector<1x1x16x16xf32>
    %1 = vector.shape_cast %0 : vector<1x1x16x16xf32> to vector<16x16xf32>
    %2 = vector.extract_strided_slice %1 {offsets = [0, 3], sizes = [16, 1], strides = [1, 1]} : vector<16x16xf32> to vector<16x1xf32>
    %3 = vector.extract_strided_slice %1 {offsets = [0, 2], sizes = [16, 1], strides = [1, 1]} : vector<16x16xf32> to vector<16x1xf32>
    %4 = vector.extract_strided_slice %1 {offsets = [0, 1], sizes = [16, 1], strides = [1, 1]} : vector<16x16xf32> to vector<16x1xf32>
    %5 = vector.extract_strided_slice %1 {offsets = [0, 14], sizes = [16, 1], strides = [1, 1]} : vector<16x16xf32> to vector<16x1xf32>
    %6 = vector.extract_strided_slice %1 {offsets = [0, 13], sizes = [16, 1], strides = [1, 1]} : vector<16x16xf32> to vector<16x1xf32>
    %7 = vector.extract_strided_slice %1 {offsets = [0, 12], sizes = [16, 1], strides = [1, 1]} : vector<16x16xf32> to vector<16x1xf32>
    %8 = tpu.concatenate %2, %3, %4, %1, %5, %6, %7 in 1 : vector<16x1xf32>, vector<16x1xf32>, vector<16x1xf32>, vector<16x16xf32>, vector<16x1xf32>, vector<16x1xf32>, vector<16x1xf32> -> vector<16x22xf32>
    %9 = vector.extract_strided_slice %8 {offsets = [0, 0], sizes = [16, 16], strides = [1, 1]} : vector<16x22xf32> to vector<16x16xf32>
    %cst = arith.constant 0.036632847 : f32
    %10 = vector.broadcast %cst : f32 to vector<16x16xf32>
    %11 = arith.mulf %9, %10 : vector<16x16xf32>
    %12 = vector.extract_strided_slice %8 {offsets = [0, 1], sizes = [16, 16], strides = [1, 1]} : vector<16x22xf32> to vector<16x16xf32>
    %cst_3 = arith.constant 0.111280762 : f32
    %13 = vector.broadcast %cst_3 : f32 to vector<16x16xf32>
    %14 = arith.mulf %12, %13 : vector<16x16xf32>
    %15 = arith.addf %11, %14 : vector<16x16xf32>
    %16 = vector.extract_strided_slice %8 {offsets = [0, 2], sizes = [16, 16], strides = [1, 1]} : vector<16x22xf32> to vector<16x16xf32>
    %cst_4 = arith.constant 0.216745317 : f32
    %17 = vector.broadcast %cst_4 : f32 to vector<16x16xf32>
    %18 = arith.mulf %16, %17 : vector<16x16xf32>
    %19 = arith.addf %15, %18 : vector<16x16xf32>
    %20 = vector.extract_strided_slice %8 {offsets = [0, 3], sizes = [16, 16], strides = [1, 1]} : vector<16x22xf32> to vector<16x16xf32>
    %cst_5 = arith.constant 0.270682156 : f32
    %21 = vector.broadcast %cst_5 : f32 to vector<16x16xf32>
    %22 = arith.mulf %20, %21 : vector<16x16xf32>
    %23 = arith.addf %19, %22 : vector<16x16xf32>
    %24 = vector.extract_strided_slice %8 {offsets = [0, 4], sizes = [16, 16], strides = [1, 1]} : vector<16x22xf32> to vector<16x16xf32>
    %cst_6 = arith.constant 0.216745317 : f32
    %25 = vector.broadcast %cst_6 : f32 to vector<16x16xf32>
    %26 = arith.mulf %24, %25 : vector<16x16xf32>
    %27 = arith.addf %23, %26 : vector<16x16xf32>
    %28 = vector.extract_strided_slice %8 {offsets = [0, 5], sizes = [16, 16], strides = [1, 1]} : vector<16x22xf32> to vector<16x16xf32>
    %cst_7 = arith.constant 0.111280762 : f32
    %29 = vector.broadcast %cst_7 : f32 to vector<16x16xf32>
    %30 = arith.mulf %28, %29 : vector<16x16xf32>
    %31 = arith.addf %27, %30 : vector<16x16xf32>
    %32 = vector.extract_strided_slice %8 {offsets = [0, 6], sizes = [16, 16], strides = [1, 1]} : vector<16x22xf32> to vector<16x16xf32>
    %cst_8 = arith.constant 0.036632847 : f32
    %33 = vector.broadcast %cst_8 : f32 to vector<16x16xf32>
    %34 = arith.mulf %32, %33 : vector<16x16xf32>
    %35 = arith.addf %31, %34 : vector<16x16xf32>
    %36 = vector.extract_strided_slice %35 {offsets = [3, 0], sizes = [1, 16], strides = [1, 1]} : vector<16x16xf32> to vector<1x16xf32>
    %37 = vector.extract_strided_slice %35 {offsets = [2, 0], sizes = [1, 16], strides = [1, 1]} : vector<16x16xf32> to vector<1x16xf32>
    %38 = vector.extract_strided_slice %35 {offsets = [1, 0], sizes = [1, 16], strides = [1, 1]} : vector<16x16xf32> to vector<1x16xf32>
    %39 = vector.extract_strided_slice %35 {offsets = [14, 0], sizes = [1, 16], strides = [1, 1]} : vector<16x16xf32> to vector<1x16xf32>
    %40 = vector.extract_strided_slice %35 {offsets = [13, 0], sizes = [1, 16], strides = [1, 1]} : vector<16x16xf32> to vector<1x16xf32>
    %41 = vector.extract_strided_slice %35 {offsets = [12, 0], sizes = [1, 16], strides = [1, 1]} : vector<16x16xf32> to vector<1x16xf32>
    %42 = tpu.concatenate %36, %37, %38, %35, %39, %40, %41 in 0 : vector<1x16xf32>, vector<1x16xf32>, vector<1x16xf32>, vector<16x16xf32>, vector<1x16xf32>, vector<1x16xf32>, vector<1x16xf32> -> vector<22x16xf32>
    %43 = vector.extract_strided_slice %42 {offsets = [0, 0], sizes = [16, 16], strides = [1, 1]} : vector<22x16xf32> to vector<16x16xf32>
    %cst_9 = arith.constant 0.036632847 : f32
    %44 = vector.broadcast %cst_9 : f32 to vector<16x16xf32>
    %45 = arith.mulf %43, %44 : vector<16x16xf32>
    %46 = vector.extract_strided_slice %42 {offsets = [1, 0], sizes = [16, 16], strides = [1, 1]} : vector<22x16xf32> to vector<16x16xf32>
    %cst_10 = arith.constant 0.111280762 : f32
    %47 = vector.broadcast %cst_10 : f32 to vector<16x16xf32>
    %48 = arith.mulf %46, %47 : vector<16x16xf32>
    %49 = arith.addf %45, %48 : vector<16x16xf32>
    %50 = vector.extract_strided_slice %42 {offsets = [2, 0], sizes = [16, 16], strides = [1, 1]} : vector<22x16xf32> to vector<16x16xf32>
    %cst_11 = arith.constant 0.216745317 : f32
    %51 = vector.broadcast %cst_11 : f32 to vector<16x16xf32>
    %52 = arith.mulf %50, %51 : vector<16x16xf32>
    %53 = arith.addf %49, %52 : vector<16x16xf32>
    %54 = vector.extract_strided_slice %42 {offsets = [3, 0], sizes = [16, 16], strides = [1, 1]} : vector<22x16xf32> to vector<16x16xf32>
    %cst_12 = arith.constant 0.270682156 : f32
    %55 = vector.broadcast %cst_12 : f32 to vector<16x16xf32>
    %56 = arith.mulf %54, %55 : vector<16x16xf32>
    %57 = arith.addf %53, %56 : vector<16x16xf32>
    %58 = vector.extract_strided_slice %42 {offsets = [4, 0], sizes = [16, 16], strides = [1, 1]} : vector<22x16xf32> to vector<16x16xf32>
    %cst_13 = arith.constant 0.216745317 : f32
    %59 = vector.broadcast %cst_13 : f32 to vector<16x16xf32>
    %60 = arith.mulf %58, %59 : vector<16x16xf32>
    %61 = arith.addf %57, %60 : vector<16x16xf32>
    %62 = vector.extract_strided_slice %42 {offsets = [5, 0], sizes = [16, 16], strides = [1, 1]} : vector<22x16xf32> to vector<16x16xf32>
    %cst_14 = arith.constant 0.111280762 : f32
    %63 = vector.broadcast %cst_14 : f32 to vector<16x16xf32>
    %64 = arith.mulf %62, %63 : vector<16x16xf32>
    %65 = arith.addf %61, %64 : vector<16x16xf32>
    %66 = vector.extract_strided_slice %42 {offsets = [6, 0], sizes = [16, 16], strides = [1, 1]} : vector<22x16xf32> to vector<16x16xf32>
    %cst_15 = arith.constant 0.036632847 : f32
    %67 = vector.broadcast %cst_15 : f32 to vector<16x16xf32>
    %68 = arith.mulf %66, %67 : vector<16x16xf32>
    %69 = arith.addf %65, %68 : vector<16x16xf32>
    %70 = vector.shape_cast %69 : vector<16x16xf32> to vector<1x1x16x16xf32>
    %c0_16 = arith.constant 0 : index
    %c0_17 = arith.constant 0 : index
    %c0_18 = arith.constant 0 : index
    %c0_19 = arith.constant 0 : index
    %71 = vector.load %arg3[%c0_16, %c0_17, %c0_18, %c0_19] : memref<1x1x16x16xf32, #tpu.memory_space<vmem>>, vector<1x1x16x16xf32>
    tpu.vector_store %arg3[%c0_16, %c0_17, %c0_18, %c0_19], %70 {strides = array<i32>} : memref<1x1x16x16xf32, #tpu.memory_space<vmem>>, vector<1x1x16x16xf32>,
    return
  }
  func.func @transform_0(%arg0: i32, %arg1: i32) -> (i32, i32, i32, i32) {
    %c0_i32 = arith.constant 0 : i32
    %c0_i32_0 = arith.constant 0 : i32
    %c0_i32_1 = arith.constant 0 : i32
    return %arg0, %arg1, %c0_i32, %c0_i32_0 : i32, i32, i32, i32
  }
  func.func @transform_1(%arg0: i32, %arg1: i32) -> (i32, i32, i32, i32) {
    %c0_i32 = arith.constant 0 : i32
    %c0_i32_0 = arith.constant 0 : i32
    %c0_i32_1 = arith.constant 0 : i32
    return %arg0, %arg1, %c0_i32, %c0_i32_0 : i32, i32, i32, i32
  }
}

</mosaic_0001>

<bundles_post_ra>
// kernel: tpu_custom_call.1
= control target key start
LH: loop header
LB: loop body
LE: loop exit
PB: predicated region body
PF: predicated region fallthrough
CT: control target
= control target key end

     0   :  { %6 = vsyncpa [#allocation3], 0  ;;  %s940_s0 = inlined_call_operand.hbm [shape: f32[2,3,16,16], index: 0, kind: input, shape index: {}]   ;;  %s941_s1 = inlined_call_operand.hbm [shape: f32[2,3,16,16], index: 1, kind: output, shape index: {}]  }
   0x1   :  { %8 = vsyncpa [#allocation3 + $0x1], 0 }
   0x2   :  { %9 = vsyncpa [#allocation4], 0 }
   0x3   :  { %11 = vsyncpa [#allocation4 + $0x1], 0  ;;  %s770_s6 = smov 0   ;;  %s772_s7 = smov 0  }
   0x4   :  { %s774_s8 = smov 0   ;;  %s776_s9 = smov 0  }
   0x5   :  { %s778_s10 = smov 0   ;;  %s780_s11 = smov 0  }
   0x6   :  { %s782_s12 = smov 0   ;;  %s784_s13 = smov 0  }
   0x7 LB: > { %s505_s14 = sadd.s32 4294967295, %s743_s13   ;;  %s506_s15 = sadd.s32 4294967294, %s743_s13   ;;  %s743_s13 = sphi %s784_s13, %s17_s13   ;;  %s739_s12 = sphi %s782_s12, %s955_s12   ;;  %s735_s11 = sphi %s780_s11, %s954_s11   ;;  %s731_s10 = sphi %s778_s10, %s953_s10   ;;  %s727_s9 = sphi %s776_s9, %s952_s9   ;;  %s723_s8 = sphi %s774_s8, %s951_s8   ;;  %s719_s7 = sphi %s772_s7, %s950_s7   ;;  %s715_s6 = sphi %s770_s6, %s949_s6  }
   0x8   : > { %s26_s16 = sadd.s32 1, %s735_s11  ;;  %s29_s17 = sadd.s32 1, %s739_s12 }
   0x9   : > { %p27_p0 = scmp.ge.s32.totalorder %s26_s16, 3  ;;  %s38_s18 = sadd.s32 1, %s723_s8 }
   0xa   : > { %p45_p1 = scmp.ne.s32.totalorder %s723_s8, %s719_s7  ;;  %p46_p2 = scmp.eq.s32.totalorder %s743_s13, 0 }
   0xb   : > { %s957_s16 = smov (%p27_p0, %s26_s16), 0  ;;  %s959_s17 = smov (!%p27_p0, %s29_s17), %s739_s12 }
   0xc   : > { %s34_s19 = ssub.s32 %s735_s11, %s957_s16  ;;  %p823_p3 = por %p46_p2, %p45_p1 }
   0xd   : > { %p31_p4 = scmp.ge.s32.totalorder %s959_s17, 2  ;;  %p51_p5 = scmp.ne.s32.totalorder %s719_s7, %s715_s6 }
   0xe   : > { %p52_p6 = scmp.eq.s32.totalorder %s505_s14, 0  ;;  %p77_p7 = scmp.eq.s32.totalorder %s505_s14, 5 }
   0xf   : > { %s961_s17 = smov (%p31_p4, %s959_s17), 0  ;;  %p83_p10 = scmp.eq.s32.totalorder %s506_s15, 5 }
  0x10   : > { %944 = sst [smem:[#allocation8_spill]] %s961_s17  ;;  %p831_p8 = por %p52_p6, %p51_p5 }
  0x11   : > { %p835_p9 = por %p77_p7, %p45_p1  ;;  %s33_s23 = ssub.s32 %s739_s12, %s961_s17 }
  0x12   : > { %s35_s24 = sor.u32 %s34_s19, %s33_s23  ;;  %p841_p12 = por %p83_p10, %p51_p5 }
  0x13   : > { %p36_p11 = scmp.eq.s32.totalorder %s35_s24, 0  ;;  %p534_p13 = scmp.lt.s32.totalorder %s743_s13, 6 }
  0x14   : > { %s103_s26 = sand.u32 1, %s723_s8   ;;  %s510_s29 = sshll.u32 %s735_s11, 1 }
  0x15   : > { %s848_s27 = scalar_select %p36_p11, %s723_s8, %s38_s18  }
  0x16   : > { %s509_s28 = sshll.u32 %s103_s26, 4  ;;  %s520_s30 = smul.u32 6, %s739_s12 }
  0x17   : > { %s107_s2 = scalar_lea.vmem [#allocation2], %s509_s28  ;;  %p527_p0 = pnand %p534_p13, %p823_p3 }
  0x18   : > { %s117_s3 = sshll.u32 %s107_s2, 4  ;;  %s112_s4 = sadd.s32 %s520_s30, %s510_s29  ;;  %s118_s3 = int_to_ptr.vmem [resolvable:$true] %s117_s3 }
  0x19   : > { %s511_s5 = sshll.u32 %s112_s4, 3  ;;  %p512_p1 = scmp.ge.s32.totalorder %s743_s13, 1 }
  0x1a   : > { %s114_s19 = scalar_lea.hbm %s940_s0, %s511_s5  ;;  %p125_p2 = scmp.lt.s32.totalorder %s743_s13, 7 }
  0x1b   : > { %s115_s23 = sshll.u32 %s114_s19, 4  ;;  %s104_s18 = scalar_lea.sflag [#allocation3], %s103_s26  ;;  %s116_s23 = int_to_ptr.hbm [resolvable:$true] %s115_s23 }
  0x1c   : > { %s745_s24 = smov 128   ;;  %s746_s17 = smov 8  }
  0x1d   : > { %529 = dma.hbm_to_vmem [thread:$0]  (!%p527_p0), %s116_s23, 256, %s118_s3, %s104_s18, %s745_s24, %s745_s24, %s746_s17  }
  0x1e   : > { %p126_p4 = pnand %p512_p1, %p125_p2 }
  0x1f   : > { %s860_s20 = sand.u32 (!%p126_p4), 1, %s719_s7  }
  0x20   : > { %129 = sbr.rel (%p126_p4) target bundleno = 357 (0x165), region = 24  ;;  %s513_s28 = sshll.u32 (!%p126_p4), %s860_s20, 4 }
  0x21   : > { %s132_s29 = scalar_lea.sflag (!%p126_p4), [#allocation3], %s860_s20  ;;  %s135_s30 = scalar_lea.vmem (!%p126_p4), [#allocation2], %s513_s28 }
  0x25   : > { %706 = dma.done.wait (%p831_p8), %s132_s29, 256  }
  0x26   : > { %708 = vsyncadd (%p831_p8), %s132_s29, 4294967040  ;;  %v155_v0 = vld [vmem:[%s135_s30] sm:$0xff]  ;;  %s747_s17 = smov 127   ;;  %s748_s26 = smov 125   ;;  %v156_v1 = vld [vmem:[%s135_s30 + $0x8] sm:$0xff]  ;;  %vm201_vm0 = vcmask 7168  }
  0x27   : > { %165 = vrot.lane.b32.xlu1 %v155_v0, %s747_s17  ;;  %159 = vrot.lane.b32.xlu0 %v155_v0, %s748_s26  ;;  %s749_s2 = smov 1   ;;  %s750_s3 = smov 3   ;;  %vm204_vm1 = vcmask 15360   ;;  %vm207_vm2 = vcmask 23552   ;;  %vm210_vm3 = vcmask 154624   ;;  %vm213_vm4 = vcmask 162816  }
  0x28   : > { %171 = vrot.lane.b32.xlu2 %v155_v0, %s749_s2  ;;  %s751_s21 = smov 5   ;;  %s752_s4 = smov 7   ;;  %vm216_vm5 = vcmask 171008   ;;  %vm291_vm6 = vcmask 1042432   ;;  %vm310_vm7 = vcmask 1043456   ;;  %vm312_vm8 = vcmask 1044480  }
  0x29   : > { %s753_s5 = smov 9   ;;  %s754_s14 = smov 126   ;;  %vm304_vm9 = vcmask 1040384   ;;  %vm306_vm10 = vcmask 1041408   ;;  %vm322_vm11 = vcmask 1046528   ;;  %vm338_vm12 = vcmask 1045504  }
  0x2a   : > { %s755_s15 = smov 124   ;;  %s756_s19 = smov 123   ;;  %vm394_vm13 = vcmask 130048  }
  0x2b   : > { %s757_s23 = smov 122   ;;  %s521_s18 = smul.u32 6, %s731_s10 }
  0x2c   : > { %s516_s24 = sshll.u32 %s727_s9, 1 }
  0x2d   : > { %s409_s29 = sadd.s32 %s521_s18, %s516_s24 }
  0x2e   : > { %s517_s9 = sshll.u32 %s409_s29, 3 }
  0x2f   : > { %167 = vrot.lane.b32.xlu1 %v156_v1, %s747_s17  ;;  %161 = vrot.lane.b32.xlu0 %v156_v1, %s748_s26 }
  0x30   : > { %173 = vrot.lane.b32.xlu2 %v156_v1, %s749_s2 }
  0x37   : > { %179 = vrot.lane.b32.xlu1 %v156_v1, %s750_s3  ;;  %177 = vrot.lane.b32.xlu0 %v155_v0, %s750_s3 }
  0x38   : > { %183 = vrot.lane.b32.xlu2 %v155_v0, %s751_s21 }
  0x3f   : > { %189 = vrot.lane.b32.xlu1 %v155_v0, %s752_s4  ;;  %185 = vrot.lane.b32.xlu0 %v156_v1, %s751_s21  ;;  %s398_s21 = scalar_lea.sflag [#allocation4], %s860_s20 }
  0x40   : > { %191 = vrot.lane.b32.xlu2 %v156_v1, %s752_s4 }
  0x47   : > { %197 = vrot.lane.b32.xlu1 %v156_v1, %s753_s5  ;;  %195 = vrot.lane.b32.xlu0 %v155_v0, %s753_s5 }
  0x82   : > { %v172_v2 = vpop.permute.xlu2 %171 }
  0x8a   : > { %v174_v7 = vpop.permute.xlu2 %173 }
  0x92   : > { %v184_v10 = vpop.permute.xlu2 %183 }
  0x99   : > { %v166_v3 = vpop.permute.xlu1 %165  ;;  %v160_v4 = vpop.permute.xlu0 %159 }
  0x9a   : > { %v202_v11 = vsel %vm201_vm0, %v160_v4, %v166_v3  ;;  %v192_v20 = vpop.permute.xlu2 %191 }
  0x9b   : > { %v205_v15 = vsel %vm204_vm1, %v202_v11, %v172_v2 }
  0xa1   : > { %v168_v5 = vpop.permute.xlu1 %167  ;;  %v162_v6 = vpop.permute.xlu0 %161 }
  0xa2   : > { %v203_v12 = vsel %vm201_vm0, %v162_v6, %v168_v5 }
  0xa3   : > { %v206_v16 = vsel %vm204_vm1, %v203_v12, %v174_v7 }
  0xa9   : > { %v180_v8 = vpop.permute.xlu1 %179  ;;  %v178_v9 = vpop.permute.xlu0 %177 }
  0xaa   : > { %v209_v17 = vsel %vm207_vm2, %v206_v16, %v180_v8  ;;  %v208_v18 = vsel %vm207_vm2, %v205_v15, %v178_v9 }
  0xab   : > { %v211_v21 = vsel %vm210_vm3, %v208_v18, %v184_v10 }
  0xb1   : > { %v190_v13 = vpop.permute.xlu1 %189  ;;  %v186_v14 = vpop.permute.xlu0 %185 }
  0xb2   : > { %v212_v19 = vsel %vm210_vm3, %v209_v17, %v186_v14  ;;  %v214_v22 = vsel %vm213_vm4, %v211_v21, %v190_v13 }
  0xb3   : > { %v215_v23 = vsel %vm213_vm4, %v212_v19, %v192_v20 }
  0xb9   : > { %v198_v24 = vpop.permute.xlu1 %197  ;;  %v196_v25 = vpop.permute.xlu0 %195 }
  0xba   : > { %v218_v26 = vsel %vm216_vm5, %v215_v23, %v198_v24  ;;  %v217_v27 = vsel %vm216_vm5, %v214_v22, %v196_v25 }
  0xbb   : > { %v222_v28 = vmul.f32 0.11128076, %v218_v26  ;;  %v233_v29 = vmul.f32 0.21674532, %v217_v27  ;;  %v221_v30 = vmul.f32 0.11128076, %v217_v27 }
  0xbc   : > { %v245_v31 = vmul.f32 0.27068216, %v217_v27  ;;  %v246_v32 = vmul.f32 0.27068216, %v218_v26  ;;  %v234_v33 = vmul.f32 0.21674532, %v218_v26 }
  0xbd   : > { %227 = vrot.lane.b32.xlu0 %v222_v28, %s747_s17  ;;  %237 = vrot.lane.b32.xlu1 %v233_v29, %s754_s14  ;;  %v220_v34 = vmul.f32 0.036632847, %v218_v26  ;;  %v219_v35 = vmul.f32 0.036632847, %v217_v27 }
  0xbe   : > { %225 = vrot.lane.b32.xlu2 %v221_v30, %s747_s17  ;;  %s411_s17 = scalar_lea.hbm %s941_s1, %s517_s9 }
  0xbf   : > { %s414_s3 = sshll.u32 %s411_s17, 4  ;;  %s415_s3 = int_to_ptr.hbm [resolvable:$true] %s414_s3 }
  0xc0   : > { %s659_s4 = sshra.s32 %s415_s3, 4  ;;  %s660_s4 = int_to_ptr.hbm [resolvable:$true] %s659_s4 }
  0xc1   : > { %p666_p7 = scmp.lt.s32.totalorder %s660_s4, %s941_s1 }
  0xc5   : > { %249 = vrot.lane.b32.xlu0 %v245_v31, %s748_s26  ;;  %251 = vrot.lane.b32.xlu1 %v246_v32, %s748_s26  ;;  %s154_s26 = scalar_lea.vmem [#allocation5], %s513_s28  ;;  %s661_s28 = scalar_lea.hbm %s660_s4, 16 }
  0xc6   : > { %239 = vrot.lane.b32.xlu2 %v234_v33, %s754_s14  ;;  %s412_s2 = sshll.u32 %s154_s26, 4  ;;  %p662_p3 = scmp.ne.s32.totalorder %s660_s4, %s661_s28  ;;  %s413_s2 = int_to_ptr.vmem [resolvable:$true] %s412_s2 }
  0xc8   : > { %p663_p5 = pnand %p662_p3, %p835_p9 }
  0xca   : > { %p664_p6 = pneg %p663_p5 }
  0xcd   : > { %259 = vrot.lane.b32.xlu0 %v234_v33, %s755_s15  ;;  %265 = vrot.lane.b32.xlu1 %v221_v30, %s756_s19 }
  0xce   : > { %257 = vrot.lane.b32.xlu2 %v233_v29, %s755_s15  ;;  %s665_s15 = scalar_lea.hbm %s941_s1, 96 }
  0xcf   : > { %p667_p8 = scmp.lt.s32.totalorder %s665_s15, %s661_s28 }
  0xd1   : > { %p668_p10 = por %p667_p8, %p666_p7 }
  0xd3   : > { %p669_p11 = pnand %p668_p10, %p664_p6 }
  0xd5   : > { %277 = vrot.lane.b32.xlu1 %v220_v34, %s757_s23  ;;  %275 = vrot.lane.b32.xlu0 %v219_v35, %s757_s23 }
  0xd6   : > { %267 = vrot.lane.b32.xlu2 %v222_v28, %s756_s19 }
 0x118   : > { %v226_v36 = vpop.permute.xlu2 %225 }
 0x119   : > { %v231_v44 = vadd.f32 %v226_v36, %v219_v35 }
 0x120   : > { %v240_v39 = vpop.permute.xlu2 %239 }
 0x128   : > { %v258_v43 = vpop.permute.xlu2 %257 }
 0x12f   : > { %v238_v37 = vpop.permute.xlu1 %237  ;;  %v228_v38 = vpop.permute.xlu0 %227 }
 0x130   : > { %v232_v42 = vadd.f32 %v228_v38, %v220_v34  ;;  %v243_v45 = vadd.f32 %v238_v37, %v231_v44  ;;  %v268_v53 = vpop.permute.xlu2 %267 }
 0x132   : > { %v244_v46 = vadd.f32 %v240_v39, %v232_v42 }
 0x137   : > { %v252_v40 = vpop.permute.xlu1 %251  ;;  %v250_v41 = vpop.permute.xlu0 %249 }
 0x138   : > { %v256_v49 = vadd.f32 %v252_v40, %v244_v46  ;;  %v255_v50 = vadd.f32 %v250_v41, %v243_v45 }
 0x13a   : > { %v263_v52 = vadd.f32 %v258_v43, %v255_v50 }
 0x13f   : > { %v266_v47 = vpop.permute.xlu1 %265  ;;  %v260_v48 = vpop.permute.xlu0 %259 }
 0x140   : > { %v264_v51 = vadd.f32 %v260_v48, %v256_v49  ;;  %v271_v54 = vadd.f32 %v266_v47, %v263_v52 }
 0x142   : > { %v272_v55 = vadd.f32 %v268_v53, %v264_v51 }
 0x147   : > { %v278_v56 = vpop.permute.xlu1 %277  ;;  %v276_v57 = vpop.permute.xlu0 %275 }
 0x148   : > { %v282_v58 = vadd.f32 %v278_v56, %v272_v55  ;;  %v281_v59 = vadd.f32 %v276_v57, %v271_v54 }
 0x14a   : > { %v293_v60 = vrot.slane %v282_v58, 5  ;;  %v298_v61 = vrot.slane %v282_v58, 3  ;;  %v300_v62 = vrot.slane %v282_v58, 1  ;;  %v284_v63 = vrot.slane %v281_v59, 3 }
 0x14b   : > { %v286_v0 = vrot.slane %v281_v59, 1  ;;  %v288_v1 = vrot.slane %v281_v59, 7  ;;  %v292_v2 = vrot.slane %v281_v59, 5  ;;  %v302_v3 = vrot.slane %v282_v58, 7 }
 0x14c   : > { %v309_v4 = vsel %vm291_vm6, %v293_v60, %v298_v61 }
 0x14d   : > { %v311_v5 = vsel %vm310_vm7, %v309_v4, %v300_v62  ;;  %v294_v6 = vsel %vm291_vm6, %v292_v2, %v293_v60  ;;  %v305_v7 = vsel %vm304_vm9, %v284_v63, %v286_v0 }
 0x14e   : > { %v313_v8 = vsel %vm312_vm8, %v311_v5, %v302_v3  ;;  %v307_v9 = vsel %vm306_vm10, %v305_v7, %v288_v1  ;;  %v317_v10 = vmul.f32 0.11128076, %v294_v6  ;;  %v315_v17 = vmul.f32 0.036632847, %v294_v6 }
 0x14f   : > { %v318_v11 = vmul.f32 0.11128076, %v313_v8  ;;  %v334_v12 = vmul.f32 0.21674532, %v313_v8  ;;  %v308_v13 = vsel %vm291_vm6, %v307_v9, %v292_v2  ;;  %v350_v14 = vmul.f32 0.27068216, %v313_v8 }
 0x150   : > { %v316_v15 = vmul.f32 0.11128076, %v308_v13  ;;  %v314_v19 = vmul.f32 0.036632847, %v308_v13  ;;  %v324_v21 = vrot.slane %v317_v10, 1  ;;  %v373_v52 = vrot.slane %v317_v10, 5 }
 0x151   : > { %v326_v16 = vrot.slane %v318_v11, 1  ;;  %v342_v18 = vrot.slane %v334_v12, 2  ;;  %v332_v22 = vmul.f32 0.21674532, %v308_v13  ;;  %v333_v23 = vmul.f32 0.21674532, %v294_v6 }
 0x152   : > { %v323_v20 = vrot.slane %v316_v15, 1  ;;  %v348_v24 = vmul.f32 0.27068216, %v308_v13  ;;  %v357_v25 = vrot.slane %v350_v14, 3  ;;  %v349_v28 = vmul.f32 0.27068216, %v294_v6 }
 0x153   : > { %v327_v27 = vsel %vm322_vm11, %v324_v21, %v326_v16  ;;  %v339_v31 = vrot.slane %v332_v22, 2  ;;  %v340_v32 = vrot.slane %v333_v23, 2  ;;  %v366_v33 = vrot.slane %v334_v12, 4 }
 0x154   : > { %v325_v26 = vsel %vm322_vm11, %v323_v20, %v324_v21  ;;  %v331_v30 = vadd.f32 %v327_v27, %v315_v17  ;;  %v381_v34 = vmul.f32 0.036632847, %v313_v8  ;;  %v354_v35 = vrot.slane %v348_v24, 3 }
 0x155   : > { %v330_v29 = vadd.f32 %v325_v26, %v314_v19  ;;  %v341_v36 = vsel %vm338_vm12, %v339_v31, %v340_v32  ;;  %v343_v37 = vsel %vm338_vm12, %v340_v32, %v342_v18  ;;  %v355_v38 = vrot.slane %v349_v28, 3 }
 0x156   : > { %v363_v39 = vrot.slane %v332_v22, 4  ;;  %v375_v40 = vrot.slane %v318_v11, 5  ;;  %v347_v42 = vadd.f32 %v343_v37, %v331_v30  ;;  %v364_v45 = vrot.slane %v333_v23, 4 }
 0x157   : > { %v346_v41 = vadd.f32 %v341_v36, %v330_v29  ;;  %v356_v43 = vsel %vm312_vm8, %v354_v35, %v355_v38  ;;  %v358_v44 = vsel %vm312_vm8, %v355_v38, %v357_v25  ;;  %v372_v46 = vrot.slane %v316_v15, 5 }
 0x158   : > { %v388_v47 = vrot.slane %v381_v34, 6  ;;  %v362_v49 = vadd.f32 %v358_v44, %v347_v42  ;;  %v365_v50 = vsel %vm310_vm7, %v363_v39, %v364_v45  ;;  %v367_v51 = vsel %vm310_vm7, %v364_v45, %v366_v33 }
 0x159   : > { %v361_v48 = vadd.f32 %v356_v43, %v346_v41  ;;  %v385_v53 = vrot.slane %v314_v19, 6  ;;  %v374_v56 = vsel %vm291_vm6, %v372_v46, %v373_v52  ;;  %v376_v57 = vsel %vm291_vm6, %v373_v52, %v375_v40 }
 0x15a   : > { %v371_v55 = vadd.f32 %v367_v51, %v362_v49  ;;  %v386_v58 = vrot.slane %v315_v17, 6 }
 0x15b   : > { %v370_v54 = vadd.f32 %v365_v50, %v361_v48 }
 0x15c   : > { %v380_v60 = vadd.f32 %v376_v57, %v371_v55  ;;  %v387_v61 = vsel %vm306_vm10, %v385_v53, %v386_v58  ;;  %v389_v62 = vsel %vm306_vm10, %v386_v58, %v388_v47 }
 0x15d   : > { %v379_v59 = vadd.f32 %v374_v56, %v370_v54 }
 0x15e   : > { %v393_v0 = vadd.f32 %v389_v62, %v380_v60 }
 0x15f   : > { %v392_v63 = vadd.f32 %v387_v61, %v379_v59 }
 0x160   : > { %396 = vst.msk [vmem:[%s154_s26 + $0x8] sm:$0xff] %vm394_vm13, %v393_v0 }
 0x161   : > { %395 = vst.msk [vmem:[%s154_s26] sm:$0xff] %vm394_vm13, %v392_v63 }
 0x162   : > { %672 = shalt.err (!%p669_p11)
}
 0x163   : > { %s758_s20 = smov 128   ;;  %s759_s18 = smov 8  }
 0x164   : > { %524 = dma.vmem_to_hbm [thread:$0]  (%p835_p9), %s413_s2, 256, %s415_s3, %s398_s21, %s758_s20, %s758_s20, %s759_s18  }
 0x165 PF: > { %p535_p13 = scmp.ge.s32.totalorder %s743_s13, 2  ;;  %s429_s24 = sand.u32 1, %s715_s6  }
 0x166   : > { %s430_s29 = scalar_lea.sflag [#allocation4], %s429_s24 }
 0x167   : > { %p531_p0 = pnand %p535_p13, %p841_p12 }
 0x169   : > { %p532_p1 = pneg %p531_p0 }
 0x16b   : > { %710 = dma.done.wait (%p532_p1), %s430_s29, 256  }
 0x16c   : > { %712 = vsyncadd (%p532_p1), %s430_s29, 4294967040  ;;  %s17_s13 = sadd.s32 1, %s743_s13   ;;  %s948_s22 = sld [smem:[#allocation8_spill]] }
 0x16d   : > { %p14_p2 = scmp.ge.s32.totalorder %s17_s13, 8   ;;  %s949_s6 = smov %s719_s7 }
 0x16e   : > { %s950_s7 = smov %s723_s8  ;;  %s951_s8 = smov %s848_s27 }
 0x16f   : > { %s952_s9 = smov %s735_s11  ;;  %s953_s10 = smov %s739_s12 }
 0x170   : > { %s954_s11 = smov %s957_s16  ;;  %16 = sbr.rel (!%p14_p2) target bundleno = 7 (0x7), region = 69 }
 0x172   : > { %s955_s12 = smov %s948_s22 }
 0x175   :  { %436 = vsyncpa [#allocation3], 1 }
 0x176   :  { %438 = vsyncpa [#allocation3 + $0x1], 1 }
 0x177   :  { %439 = vsyncpa [#allocation4], 1 }
 0x178   :  { %441 = vsyncpa [#allocation4 + $0x1], 1 }

</bundles_post_ra>
